<compile_context>
chip_gen: v6e
topology: v6e:2x2x1
jax: 0.10.0
libtpu: 0.0.40
codegen_flags: <defaults>
</compile_context>

<pallas_src>
import math
from functools import partial

import jax
import jax.numpy as jnp
from jax.experimental import pallas as pl
from jax.experimental.pallas import tpu as pltpu


# ----------------------------- config ---------------------------------------
class ViTConfig:
    def __init__(self, n_layers, d_model, d_proj, image_res, patch_size,
                 n_heads, norm_data=None, dropout=0.0, mlp_mult=4,
                 causal_attn=False):
        self.n_layers = n_layers
        self.d_model = d_model
        self.d_proj = d_proj
        self.image_res = image_res
        self.patch_size = patch_size
        self.n_heads = n_heads
        self.norm_data = norm_data
        self.dropout = dropout
        self.mlp_mult = mlp_mult
        self.causal_attn = causal_attn
        im_h, im_w = image_res
        assert im_h % patch_size == 0 and im_w % patch_size == 0
        self.num_patches = (im_h // patch_size, im_w // patch_size)
        self.seq_length = self.num_patches[0] * self.num_patches[1] + 1
        assert d_model % n_heads == 0
        self.d_head = d_model // n_heads


# ----------------------------- kernel ---------------------------------------
def attention_kernel(x_ref, wqkv_ref, bqkv_ref, wc_ref, bc_ref, o_ref,
                     acc_ref, *, scale, seq_len):
    # Grid step = (batch element b, head h).
    #   x_ref:    (1, S_pad, D)   bf16   (constant block across the head axis)
    #   wqkv_ref: (1, D, 3*Dh)    bf16   (this head's fused q/k/v columns)
    #   bqkv_ref: (1, 1, 3*Dh)    f32
    #   wc_ref:   (1, Dh, D)      bf16   (this head's output-projection rows)
    #   bc_ref:   (1, D)          f32
    #   o_ref:    (1, S_pad, D)   out dtype
    #   acc_ref:  (S_pad, D)      f32 scratch, accumulated over heads
    h = pl.program_id(1)
    n_heads = pl.num_programs(1)
    dh3 = wqkv_ref.shape[-1]
    dh = dh3 // 3

    x = x_ref[0]                                               # (S_pad, D) bf16

    # Fused per-head QKV projection: (S_pad, D) @ (D, 3*Dh), f32 accumulation.
    qkv = jnp.dot(x, wqkv_ref[0],
                  preferred_element_type=jnp.float32) + bqkv_ref[0]

    # Fold the 1/sqrt(d_head) scale into q once, then drop to bf16 for the MXU.
    q = (qkv[:, 0 * dh:1 * dh] * scale).astype(jnp.bfloat16)   # (S_pad, Dh)
    k = qkv[:, 1 * dh:2 * dh].astype(jnp.bfloat16)
    v = qkv[:, 2 * dh:3 * dh].astype(jnp.bfloat16)

    # Scores: contract the last axes (no explicit k.T -> no XLU transpose).
    s = jnp.einsum('qd,kd->qk', q, k,
                   preferred_element_type=jnp.float32)         # (S_pad, S_pad)

    # Mask out padded key positions (S_pad >= seq_len).
    key_idx = jax.lax.broadcasted_iota(jnp.int32, s.shape, 1)
    s = jnp.where(key_idx < seq_len, s, -1e30)

    # Numerically-stable softmax over keys, in f32 (VPU/EUP path).
    m = jnp.max(s, axis=-1, keepdims=True)
    e = jnp.exp(s - m)
    p = e * pl.reciprocal(jnp.sum(e, axis=-1, keepdims=True), approx=True)
    # score dropout: cfg.dropout == 0.0 (asserted in wrapper) -> identity.

    # P @ V in bf16, f32 accumulation.
    z = jnp.dot(p.astype(jnp.bfloat16), v,
                preferred_element_type=jnp.float32)            # (S_pad, Dh)

    # This head's contribution to the output projection, accumulated in f32.
    zc = jnp.dot(z.astype(jnp.bfloat16), wc_ref[0],
                 preferred_element_type=jnp.float32)           # (S_pad, D)

    @pl.when(h == 0)
    def _():
        acc_ref[...] = jnp.zeros_like(acc_ref)

    acc_ref[...] += zc

    @pl.when(h == n_heads - 1)
    def _():
        # Lane-dense store of the full-D projected output (single store slab).
        o_ref[0] = (acc_ref[...] + bc_ref[...]).astype(o_ref.dtype)


# ----------------------------- wrapper ---------------------------------------
def attention_forward(x, params, cfg: ViTConfig):
    assert not cfg.causal_attn, "causal attention masking not implemented"
    assert cfg.dropout == 0.0, "kernel implements eval semantics (dropout=0)"

    B, S, D = x.shape
    assert D == cfg.d_model and S == cfg.seq_length
    H, Dh = cfg.n_heads, cfg.d_head

    wq, bq, wk, bk, wv, bv, wc, bc = params

    # nn.Linear computes y = x @ W.T + b.  Pre-split the fused QKV weight per
    # head so the kernel never has to relayout sub-128-lane head slices:
    #   wqkv_h[h] = [wq.T | wk.T | wv.T][:, h*Dh:(h+1)*Dh] columns -> (D, 3*Dh)
    def per_head_cols(w):                       # (D, D) -> (H, D, Dh)
        return jnp.transpose(w.T.reshape(D, H, Dh), (1, 0, 2))

    wqkv_h = jnp.concatenate(
        [per_head_cols(wq), per_head_cols(wk), per_head_cols(wv)],
        axis=-1).astype(jnp.bfloat16)                          # (H, D, 3*Dh)
    bqkv_h = jnp.concatenate(
        [bq.reshape(H, Dh), bk.reshape(H, Dh), bv.reshape(H, Dh)],
        axis=-1).reshape(H, 1, 3 * Dh).astype(jnp.float32)     # (H, 1, 3*Dh)
    wc_h = wc.T.reshape(H, Dh, D).astype(jnp.bfloat16)         # (H, Dh, D)
    bc2 = bc.reshape(1, D).astype(jnp.float32)                 # (1, D)

    # Pad the sequence to a sublane multiple; padded keys are masked in-kernel.
    S_pad = ((S + 7) // 8) * 8
    x_pad = jnp.pad(x, ((0, 0), (0, S_pad - S), (0, 0))).astype(jnp.bfloat16)

    kernel = partial(attention_kernel, scale=1.0 / math.sqrt(Dh), seq_len=S)

    out_pad = pl.pallas_call(
        kernel,
        out_shape=jax.ShapeDtypeStruct((B, S_pad, D), x.dtype),
        grid_spec=pltpu.PrefetchScalarGridSpec(
            num_scalar_prefetch=0,
            grid=(B, H),                     # batch parallel, heads = reduction
            in_specs=[
                pl.BlockSpec((1, S_pad, D), lambda b, h: (b, 0, 0)),     # x
                pl.BlockSpec((1, D, 3 * Dh), lambda b, h: (h, 0, 0)),    # wqkv
                pl.BlockSpec((1, 1, 3 * Dh), lambda b, h: (h, 0, 0)),    # bqkv
                pl.BlockSpec((1, Dh, D), lambda b, h: (h, 0, 0)),        # wc
                pl.BlockSpec((1, D), lambda b, h: (0, 0)),               # bc
            ],
            out_specs=pl.BlockSpec((1, S_pad, D), lambda b, h: (b, 0, 0)),
            scratch_shapes=[pltpu.VMEM((S_pad, D), jnp.float32)],
        ),
        compiler_params=pltpu.CompilerParams(
            dimension_semantics=("parallel", "arbitrary"),
            vmem_limit_bytes=64 * 1024 * 1024,
        ),
    )(x_pad, wqkv_h, bqkv_h, wc_h, bc2)

    return out_pad[:, :S, :]


# ----------------------------- reference -------------------------------------
def attention_reference(x, params, cfg: ViTConfig):
    wq, bq, wk, bk, wv, bv, wc, bc = params
    B, S, D = x.shape
    H, Dh = cfg.n_heads, cfg.d_head
    q = x @ wq.T + bq
    k = x @ wk.T + bk
    v = x @ wv.T + bv
    q = q.reshape(B, S, H, Dh)
    k = k.reshape(B, S, H, Dh)
    v = v.reshape(B, S, H, Dh)
    attn = jnp.einsum('bqhd,bkhd->bhqk', q, k) / math.sqrt(Dh)
    scores = jax.nn.softmax(attn, axis=-1)
    z = jnp.einsum('bhqk,bkhd->bqhd', scores, v).reshape(B, S, D)
    return z @ wc.T + bc


# ----------------------------- main ------------------------------------------
if __name__ == "__main__":
    cfg = ViTConfig(
        n_layers=1, d_model=32, d_proj=10,
        image_res=(32, 32), patch_size=8, n_heads=4,
    )

    B, S, D = 2, cfg.seq_length, cfg.d_model   # (2, 17, 32)

    key = jax.random.PRNGKey(0)
    keys = jax.random.split(key, 9)
    x = jax.random.normal(keys[0], (B, S, D), dtype=jnp.float32)

    # deterministic "nn.Linear"-style init: W, b ~ U(-1/sqrt(D), 1/sqrt(D))
    bound = 1.0 / math.sqrt(D)

    def lin(kw, kb):
        w = jax.random.uniform(kw, (D, D), jnp.float32, -bound, bound)
        b = jax.random.uniform(kb, (D,), jnp.float32, -bound, bound)
        return w, b

    wq, bq = lin(keys[1], keys[2])
    wk, bk = lin(keys[3], keys[4])
    wv, bv = lin(keys[5], keys[6])
    wc, bc = lin(keys[7], keys[8])
    params = (wq, bq, wk, bk, wv, bv, wc, bc)

    out = jax.block_until_ready(attention_forward(x, params, cfg))
    ref = attention_reference(x, params, cfg)

    assert out.shape == (B, S, D)
    # bf16 MXU operands + approx softmax reciprocal -> loosened tolerance vs
    # the exact f32 reference.
    max_err = jnp.max(jnp.abs(out - ref))
    assert jnp.allclose(out, ref, atol=5e-2, rtol=5e-2), (
        f"mismatch vs reference: max abs err {max_err}")

    print("KERNEL_OK")
</pallas_src>

<mosaic_0001>
module attributes {stable_mosaic.version = 11 : i64} {
  func.func @attention_kernel(%arg0: i32, %arg1: i32, %arg2: memref<1x24x32xbf16, #tpu.memory_space<vmem>>, %arg3: memref<1x32x24xbf16, #tpu.memory_space<vmem>>, %arg4: memref<1x1x24xf32, #tpu.memory_space<vmem>>, %arg5: memref<1x8x32xbf16, #tpu.memory_space<vmem>>, %arg6: memref<1x32xf32, #tpu.memory_space<vmem>>, %arg7: memref<1x24x32xf32, #tpu.memory_space<vmem>>, %arg8: memref<24x32xf32, #tpu.memory_space<vmem>>) attributes {dimension_semantics = [#tpu.dimension_semantics<parallel>, #tpu.dimension_semantics<arbitrary>], iteration_bounds = array<i64: 2, 4>, scalar_prefetch = 0 : i64, scratch_operands = 1 : i64, tpu.core_type = #tpu.core_type<tc>, window_params = [{transform_indices = @transform_0, window_bounds = array<i64: 1, 24, 32>}, {transform_indices = @transform_1, window_bounds = array<i64: 1, 32, 24>}, {transform_indices = @transform_2, window_bounds = array<i64: 1, 1, 24>}, {transform_indices = @transform_3, window_bounds = array<i64: 1, 8, 32>}, {pipeline_mode = #tpu.pipeline_mode<synchronous>, transform_indices = @transform_4, window_bounds = array<i64: 1, 32>}, {transform_indices = @transform_5, window_bounds = array<i64: 1, 24, 32>}]} {
    %c0 = arith.constant 0 : index
    %c0_0 = arith.constant 0 : index
    %c0_1 = arith.constant 0 : index
    %0 = vector.load %arg2[%c0, %c0_0, %c0_1] : memref<1x24x32xbf16, #tpu.memory_space<vmem>>, vector<1x24x32xbf16>
    %1 = vector.shape_cast %0 : vector<1x24x32xbf16> to vector<24x32xbf16>
    %c0_2 = arith.constant 0 : index
    %c0_3 = arith.constant 0 : index
    %c0_4 = arith.constant 0 : index
    %2 = vector.load %arg3[%c0_2, %c0_3, %c0_4] : memref<1x32x24xbf16, #tpu.memory_space<vmem>>, vector<1x32x24xbf16>
    %3 = vector.shape_cast %2 : vector<1x32x24xbf16> to vector<32x24xbf16>
    %cst = arith.constant dense<0.000000e+00> : vector<24x24xf32>
    %4 = tpu.matmul %1, %3, %cst {dimension_numbers = #tpu.dot_dimension_numbers<[1], [0], [0], [1], [0, 0, 1, 1], [], []>} : vector<24x32xbf16>, vector<32x24xbf16>, vector<24x24xf32> -> vector<24x24xf32>
    %c0_5 = arith.constant 0 : index
    %c0_6 = arith.constant 0 : index
    %c0_7 = arith.constant 0 : index
    %5 = vector.load %arg4[%c0_5, %c0_6, %c0_7] : memref<1x1x24xf32, #tpu.memory_space<vmem>>, vector<1x1x24xf32>
    %6 = vector.shape_cast %5 : vector<1x1x24xf32> to vector<1x24xf32>
    %7 = vector.broadcast %6 : vector<1x24xf32> to vector<24x24xf32>
    %8 = arith.addf %4, %7 : vector<24x24xf32>
    %9 = vector.extract_strided_slice %8 {offsets = [0, 0], sizes = [24, 8], strides = [1, 1]} : vector<24x24xf32> to vector<24x8xf32>
    %cst_8 = arith.constant 0.353553385 : f32
    %10 = vector.broadcast %cst_8 : f32 to vector<24x8xf32>
    %11 = arith.mulf %9, %10 : vector<24x8xf32>
    %12 = arith.truncf %11 : vector<24x8xf32> to vector<24x8xbf16>
    %13 = vector.extract_strided_slice %8 {offsets = [0, 8], sizes = [24, 8], strides = [1, 1]} : vector<24x24xf32> to vector<24x8xf32>
    %14 = arith.truncf %13 : vector<24x8xf32> to vector<24x8xbf16>
    %15 = vector.extract_strided_slice %8 {offsets = [0, 16], sizes = [24, 8], strides = [1, 1]} : vector<24x24xf32> to vector<24x8xf32>
    %16 = arith.truncf %15 : vector<24x8xf32> to vector<24x8xbf16>
    "tpu.trace_start"() <{level = 10 : i32, message = "qd,kd->qk"}> : () -> ()
    %cst_9 = arith.constant dense<0.000000e+00> : vector<24x24xf32>
    %17 = tpu.matmul %12, %14, %cst_9 {dimension_numbers = #tpu.dot_dimension_numbers<[1], [1], [0], [0], [0, 0, 1, 0], [], []>} : vector<24x8xbf16>, vector<24x8xbf16>, vector<24x24xf32> -> vector<24x24xf32>
    "tpu.trace_stop"() : () -> ()
    %18 = tpu.iota {dimensions = array<i32: 1>} : vector<24x24xi32>
    %c17_i32 = arith.constant 17 : i32
    %19 = vector.broadcast %c17_i32 : i32 to vector<24x24xi32>
    %20 = arith.cmpi slt, %18, %19 : vector<24x24xi32>
    %cst_10 = arith.constant -1.000000e+30 : f32
    %21 = vector.broadcast %cst_10 : f32 to vector<24x24xf32>
    %22 = arith.select %20, %17, %21 : vector<24x24xi1>, vector<24x24xf32>
    %cst_11 = arith.constant dense<0xFF800000> : vector<24xf32>
    %23 = vector.multi_reduction <maximumf>, %22, %cst_11 [1] : vector<24x24xf32> to vector<24xf32>
    %24 = vector.shape_cast %23 : vector<24xf32> to vector<24x1xf32>
    %25 = vector.broadcast %24 : vector<24x1xf32> to vector<24x24xf32>
    %26 = arith.subf %22, %25 : vector<24x24xf32>
    %27 = math.exp %26 : vector<24x24xf32>
    %cst_12 = arith.constant dense<0.000000e+00> : vector<24xf32>
    %28 = vector.multi_reduction <add>, %27, %cst_12 [1] : vector<24x24xf32> to vector<24xf32>
    %29 = vector.shape_cast %28 : vector<24xf32> to vector<24x1xf32>
    %30 = tpu.reciprocal %29 {approx = true} : vector<24x1xf32> -> vector<24x1xf32>
    %31 = vector.broadcast %30 : vector<24x1xf32> to vector<24x24xf32>
    %32 = arith.mulf %27, %31 : vector<24x24xf32>
    %33 = arith.truncf %32 : vector<24x24xf32> to vector<24x24xbf16>
    %cst_13 = arith.constant dense<0.000000e+00> : vector<24x8xf32>
    %34 = tpu.matmul %33, %16, %cst_13 {dimension_numbers = #tpu.dot_dimension_numbers<[1], [0], [0], [1], [0, 0, 1, 1], [], []>} : vector<24x24xbf16>, vector<24x8xbf16>, vector<24x8xf32> -> vector<24x8xf32>
    %35 = arith.truncf %34 : vector<24x8xf32> to vector<24x8xbf16>
    %c0_14 = arith.constant 0 : index
    %c0_15 = arith.constant 0 : index
    %c0_16 = arith.constant 0 : index
    %36 = vector.load %arg5[%c0_14, %c0_15, %c0_16] : memref<1x8x32xbf16, #tpu.memory_space<vmem>>, vector<1x8x32xbf16>
    %37 = vector.shape_cast %36 : vector<1x8x32xbf16> to vector<8x32xbf16>
    %cst_17 = arith.constant dense<0.000000e+00> : vector<24x32xf32>
    %38 = tpu.matmul %35, %37, %cst_17 {dimension_numbers = #tpu.dot_dimension_numbers<[1], [0], [0], [1], [0, 0, 1, 1], [], []>} : vector<24x8xbf16>, vector<8x32xbf16>, vector<24x32xf32> -> vector<24x32xf32>
    %c0_i32 = arith.constant 0 : i32
    %39 = arith.cmpi eq, %arg1, %c0_i32 : i32
    %40 = arith.extui %39 : i1 to i32
    %c0_i32_18 = arith.constant 0 : i32
    %41 = arith.cmpi ne, %40, %c0_i32_18 : i32
    scf.if %41 {
      %cst_24 = arith.constant 0.000000e+00 : f32
      %48 = vector.broadcast %cst_24 : f32 to vector<24x32xf32>
      %c0_25 = arith.constant 0 : index
      %c0_26 = arith.constant 0 : index
      %49 = vector.load %arg8[%c0_25, %c0_26] : memref<24x32xf32, #tpu.memory_space<vmem>>, vector<24x32xf32>
      tpu.vector_store %arg8[%c0_25, %c0_26], %48 {strides = array<i32>} : memref<24x32xf32, #tpu.memory_space<vmem>>, vector<24x32xf32>,
    } else {
    }
    %c0_19 = arith.constant 0 : index
    %c0_20 = arith.constant 0 : index
    %42 = vector.load %arg8[%c0_19, %c0_20] : memref<24x32xf32, #tpu.memory_space<vmem>>, vector<24x32xf32>
    %43 = arith.addf %42, %38 : vector<24x32xf32>
    %c0_21 = arith.constant 0 : index
    %c0_22 = arith.constant 0 : index
    %44 = vector.load %arg8[%c0_21, %c0_22] : memref<24x32xf32, #tpu.memory_space<vmem>>, vector<24x32xf32>
    tpu.vector_store %arg8[%c0_21, %c0_22], %43 {strides = array<i32>} : memref<24x32xf32, #tpu.memory_space<vmem>>, vector<24x32xf32>,
    %c3_i32 = arith.constant 3 : i32
    %45 = arith.cmpi eq, %arg1, %c3_i32 : i32
    %46 = arith.extui %45 : i1 to i32
    %c0_i32_23 = arith.constant 0 : i32
    %47 = arith.cmpi ne, %46, %c0_i32_23 : i32
    scf.if %47 {
      %c0_24 = arith.constant 0 : index
      %c0_25 = arith.constant 0 : index
      %48 = vector.load %arg8[%c0_24, %c0_25] : memref<24x32xf32, #tpu.memory_space<vmem>>, vector<24x32xf32>
      %c0_26 = arith.constant 0 : index
      %c0_27 = arith.constant 0 : index
      %49 = vector.load %arg6[%c0_26, %c0_27] : memref<1x32xf32, #tpu.memory_space<vmem>>, vector<1x32xf32>
      %50 = vector.broadcast %49 : vector<1x32xf32> to vector<24x32xf32>
      %51 = arith.addf %48, %50 : vector<24x32xf32>
      %c0_28 = arith.constant 0 : index
      %c0_29 = arith.constant 0 : index
      %c0_30 = arith.constant 0 : index
      %52 = vector.load %arg7[%c0_28, %c0_29, %c0_30] : memref<1x24x32xf32, #tpu.memory_space<vmem>>, vector<1x24x32xf32>
      %53 = vector.shape_cast %52 : vector<1x24x32xf32> to vector<24x32xf32>
      %54 = vector.shape_cast %51 : vector<24x32xf32> to vector<1x24x32xf32>
      tpu.vector_store %arg7[%c0_28, %c0_29, %c0_30], %54 {strides = array<i32>} : memref<1x24x32xf32, #tpu.memory_space<vmem>>, vector<1x24x32xf32>,
    } else {
    }
    return
  }
  func.func @transform_0(%arg0: i32, %arg1: i32) -> (i32, i32, i32) {
    %c0_i32 = arith.constant 0 : i32
    %c0_i32_0 = arith.constant 0 : i32
    %c0_i32_1 = arith.constant 0 : i32
    return %arg0, %c0_i32, %c0_i32_0 : i32, i32, i32
  }
  func.func @transform_1(%arg0: i32, %arg1: i32) -> (i32, i32, i32) {
    %c0_i32 = arith.constant 0 : i32
    %c0_i32_0 = arith.constant 0 : i32
    %c0_i32_1 = arith.constant 0 : i32
    return %arg1, %c0_i32, %c0_i32_0 : i32, i32, i32
  }
  func.func @transform_2(%arg0: i32, %arg1: i32) -> (i32, i32, i32) {
    %c0_i32 = arith.constant 0 : i32
    %c0_i32_0 = arith.constant 0 : i32
    %c0_i32_1 = arith.constant 0 : i32
    return %arg1, %c0_i32, %c0_i32_0 : i32, i32, i32
  }
  func.func @transform_3(%arg0: i32, %arg1: i32) -> (i32, i32, i32) {
    %c0_i32 = arith.constant 0 : i32
    %c0_i32_0 = arith.constant 0 : i32
    %c0_i32_1 = arith.constant 0 : i32
    return %arg1, %c0_i32, %c0_i32_0 : i32, i32, i32
  }
  func.func @transform_4(%arg0: i32, %arg1: i32) -> (i32, i32) {
    %c0_i32 = arith.constant 0 : i32
    %c0_i32_0 = arith.constant 0 : i32
    %c0_i32_1 = arith.constant 0 : i32
    return %c0_i32, %c0_i32_0 : i32, i32
  }
  func.func @transform_5(%arg0: i32, %arg1: i32) -> (i32, i32, i32) {
    %c0_i32 = arith.constant 0 : i32
    %c0_i32_0 = arith.constant 0 : i32
    %c0_i32_1 = arith.constant 0 : i32
    return %arg0, %c0_i32, %c0_i32_0 : i32, i32, i32
  }
}

</mosaic_0001>

<bundles_post_ra>
// kernel: tpu_custom_call.1
= control target key start
LH: loop header
LB: loop body
LE: loop exit
PB: predicated region body
PF: predicated region fallthrough
CT: control target
= control target key end

     0   :  { %10 = vsyncpa [#allocation4], 0  ;;  %s1273_s0 = inlined_call_operand.vmem [shape: bf16[2,24,32], index: 0, kind: input, shape index: {}]   ;;  %s1274_s1 = inlined_call_operand.vmem [shape: bf16[4,32,24], index: 1, kind: input, shape index: {}]   ;;  %s1275_s2 = inlined_call_operand.vmem [shape: f32[4,1,24], index: 2, kind: input, shape index: {}]   ;;  %s1276_s3 = inlined_call_operand.vmem [shape: bf16[4,8,32], index: 3, kind: input, shape index: {}]   ;;  %s1277_s4 = inlined_call_operand.vmem [shape: f32[1,32], index: 4, kind: input, shape index: {}]   ;;  %s1278_s5 = inlined_call_operand.hbm [shape: f32[2,24,32], index: 5, kind: output, shape index: {}]  }
   0x1   :  { %12 = vsyncpa [#allocation4 + $0x1], 0  ;;  %s1074_s18 = smov 0   ;;  %s1076_s19 = smov 0  }
   0x2   :  { %s1078_s20 = smov 0   ;;  %s1080_s21 = smov 0  }
   0x3   :  { %s1082_s22 = smov 0   ;;  %s1084_s23 = smov 0  }
   0x4   :  { %s1086_s24 = smov 0   ;;  %s1088_s25 = smov 0  }
   0x5 LB: > { %s771_s26 = sadd.s32 4294967295, %s1036_s25   ;;  %s772_s27 = sadd.s32 4294967294, %s1036_s25   ;;  %s1036_s25 = sphi %s1088_s25, %s18_s25   ;;  %s1032_s24 = sphi %s1086_s24, %s1287_s24   ;;  %s1028_s23 = sphi %s1084_s23, %s1286_s23   ;;  %s1024_s22 = sphi %s1082_s22, %s1285_s22   ;;  %s1020_s21 = sphi %s1080_s21, %s1284_s21   ;;  %s1016_s20 = sphi %s1078_s20, %s1283_s20   ;;  %s1012_s19 = sphi %s1076_s19, %s1282_s19   ;;  %s1008_s18 = sphi %s1074_s18, %s1281_s18  }
   0x6   : > { %s27_s28 = sadd.s32 1, %s1028_s23  ;;  %s30_s29 = sadd.s32 1, %s1032_s24 }
   0x7   : > { %p28_p0 = scmp.ge.s32.totalorder %s27_s28, 4  ;;  %p172_p1 = scmp.ne.s32.totalorder %s1016_s20, %s1012_s19 }
   0x8   : > { %p173_p2 = scmp.eq.s32.totalorder %s771_s26, 7  ;;  %p178_p4 = scmp.ne.s32.totalorder %s1012_s19, %s1008_s18 }
   0x9   : > { %s1289_s28 = smov (%p28_p0, %s27_s28), 0  ;;  %s1291_s29 = smov (!%p28_p0, %s30_s29), %s1032_s24 }
   0xa   : > { %p1123_p3 = por %p173_p2, %p172_p1  ;;  %p32_p5 = scmp.ge.s32.totalorder %s1291_s29, 2 }
   0xb   : > { %p179_p6 = scmp.eq.s32.totalorder %s772_s27, 7  ;;  %p775_p7 = scmp.ge.s32.totalorder %s1036_s25, 1 }
   0xc   : > { %p229_p8 = scmp.lt.s32.totalorder %s1036_s25, 9  ;;  %s1293_s29 = smov (%p32_p5, %s1291_s29), 0 }
   0xd   : > { %p1133_p9 = por %p179_p6, %p178_p4  ;;  %s159_s7 = ssub.s32 %s1032_s24, %s1293_s29 }
   0xe   : > { %p230_p10 = pnand %p775_p7, %p229_p8  ;;  %s162_s8 = sadd.s32 1, %s1016_s20 }
   0xf   : > { %p160_p11 = scmp.eq.s32.totalorder %s159_s7, 0  ;;  %s266_s10 = sand.u32 (!%p230_p10), 1, %s1012_s19  }
  0x10   : > { %233 = sbr.rel (%p230_p10) target bundleno = 1328 (0x530), region = 40  ;;  %p274_p12 = scmp.lt.s32.totalorder (!%p230_p10), %s1020_s21, 3 }
  0x11   : > { %s1141_s9 = scalar_select %p160_p11, %s1016_s20, %s162_s8  }
  0x12   : > { %s1147_s11 = smul.u32 (!%p230_p10), 24, %s266_s10  ;;  %p269_p13 = scmp.lt.s32.totalorder (!%p230_p10), %s1024_s22, 1 }
  0x13   : > { %p793_p0 = scmp.ne.s32.totalorder (!%p230_p10), %s1020_s21, 0 }
  0x15   : > { %s1151_s12 = scalar_select %p274_p12, %s1020_s21, 3  ;;  %vm321_vm0 = vcmask 261120   ;;  %vm389_vm1 = vcmask 64512   ;;  %v450_v23 = vlaneseq  ;;  %vm456_vm3 = vcmask 195584  }
  0x16   : > { %s270_s17 = scalar_select %p269_p13, %s1024_s22, 1  ;;  %vm503_vm4 = vcmask 1043456  }
  0x17   : > { %s799_s13 = sshll.u32 %s1151_s12, 4  ;;  %s281_s15 = scalar_lea.vmem %s1275_s2, %s1151_s12  ;;  %v451_v24 = vand.u32 127, %v450_v23 }
  0x18   : > { %s278_s16 = scalar_lea.vmem %s1274_s1, %s799_s13  ;;  %s850_s26 = smul.u32 12, %s270_s17  ;;  %v780_v4 = vld [vmem:[%s281_s15] ss:$0 sm:$0xff] }
  0x19   : > { %v928_v0 = vld [vmem:[%s278_s16 + $0x8] sm:$0xff]   ;;  %v929_v1 = vld [vmem:[%s278_s16] sm:$0xff]   ;;  %s1038_s16 = smov 120   ;;  %vm452_vm2 = vcmp.lt.s32.totalorder %v451_v24, 17  ;;  %s1039_s17 = smov 112  }
  0x1a   : > { %815 = vmatprep.subr.bf16.mxu0 %v928_v0  ;;  %s273_s8 = scalar_lea.vmem %s1273_s0, %s850_s26  ;;  %s779_s26 = sshll.u32 %s1151_s12, 2 }
  0x1b   : > { %816 = vmatpush3.bf16.msra.mxu0 %v928_v0  ;;  %v930_v2 = vld [vmem:[%s273_s8] sm:$0xff]   ;;  %v931_v3 = vld [vmem:[%s273_s8 + $0x8] ss:$0 sps:$4 sm:$0xff]   ;;  %s285_s8 = scalar_lea.vmem %s1276_s3, %s779_s26  ;;  %s1192_s12 = scalar_lea.vmem [#allocation3], %s1147_s11 }
  0x1c   : > { %817 = vmatprep.subr.bf16.mxu0 %v929_v1  ;;  %819 = vmatprep.mubr.msk.bf16.mxu0 %vm321_vm0, %v930_v2  ;;  %v557_v0 = vld [vmem:[%s285_s8] sm:$0xf] }
  0x1f   : > { %818 = vmatpush3.bf16.msra.mxu0 %v929_v1  ;;  %v565_v1 = vsel %vm503_vm4, %v557_v0, 0 }
  0x22   : > { %820 = vmatmul.mubr.msk.bf16.vlgmr.msra.gmra.mxu0 %vm321_vm0, %v931_v3 }
  0xe2   : > { %v821_v5 = vpop.f32.mrf.mxu0 }
  0xe3   : > { %v371_v6 = vadd.f32 %v821_v5, %v780_v4 }
  0xe4   : > { %v362_v7 = vpop.f32.mrf.mxu0 }
  0xe5   : > { %v382_v8 = vpack.c.bf16 %v371_v6, %v371_v6  ;;  %v363_v10 = vadd.f32 %v780_v4, %v362_v7  ;;  %v378_v21 = vmul.f32 0.35355338, %v371_v6 }
  0xe6   : > { %v822_v9 = vpop.f32.mrf.mxu0 }
  0xe7   : > { %387 = vrot.lane.b32.xlu0 %v382_v8, %s1038_s16  ;;  %v376_v13 = vmul.f32 0.35355338, %v363_v10  ;;  %v380_v22 = vpack.c.bf16 %v378_v21, %v378_v21 }
  0xe8   : > { %v365_v11 = vpop.f32.mrf.mxu0 }
  0xe9   : > { %v366_v12 = vadd.f32 %v780_v4, %v365_v11 }
  0xeb   : > { %v377_v14 = vmul.f32 0.35355338, %v366_v12  ;;  %v381_v15 = vpack.c.bf16 %v366_v12, %v363_v10 }
  0xed   : > { %385 = vrot.lane.b32.xlu0 %v381_v15, %s1038_s16  ;;  %v379_v16 = vpack.c.bf16 %v377_v14, %v376_v13 }
  0xef   : > { %827 = vmatprep.mubr.msk.bf16.mxu1 %vm389_vm1, %v379_v16 }
 0x159   : > { %v388_v17 = vpop.permute.xlu0 %387 }
 0x15a   : > { %845 = vmatprep.subr.msk.bf16.mxu1 %vm389_vm1, %v388_v17  ;;  %v400_v18 = vsel %vm389_vm1, %v388_v17, 0 }
 0x15b   : > { %824 = vmatpush3.bf16.xpose.msra.mxu1 %v400_v18 }
 0x15f   : > { %v386_v19 = vpop.permute.xlu0 %385 }
 0x160   : > { %846 = vmatprep.subr.msk.bf16.mxu1 %vm389_vm1, %v386_v19  ;;  %v397_v20 = vsel %vm389_vm1, %v386_v19, 0 }
 0x163   : > { %826 = vmatpush3.bf16.xpose.msra.mxu1 %v397_v20 }
 0x16a   : > { %828 = vmatmul.mubr.msk.bf16.vlgmr.msra.gmra.mxu1 %vm389_vm1, %v380_v22 }
 0x22a   : > { %v829_v25 = vpop.f32.mrf.mxu1 }
 0x22b   : > { %v455_v26 = vsel %vm452_vm2, %v829_v25, -1e+30 }
 0x22c   : > { %v436_v27 = vpop.f32.mrf.mxu1  ;;  %v463_v28 = vsel %vm456_vm3, %v455_v26, -inf }
 0x22d   : > { %v453_v29 = vsel %vm452_vm2, %v436_v27, -1e+30  ;;  %464 = vmax.xlane.f32.xlu0 %v463_v28 }
 0x22e   : > { %v830_v30 = vpop.f32.mrf.mxu1  ;;  %v457_v31 = vsel %vm456_vm3, %v453_v29, -inf }
 0x22f   : > { %458 = vmax.xlane.f32.xlu1 %v457_v31 }
 0x230   : > { %v439_v32 = vpop.f32.mrf.mxu1 }
 0x231   : > { %v454_v33 = vsel %vm452_vm2, %v439_v32, -1e+30 }
 0x232   : > { %v460_v34 = vsel %vm456_vm3, %v454_v33, -inf }
 0x233   : > { %461 = vmax.xlane.f32.xlu1 %v460_v34 }
 0x244   : > { %494 = vrot.lane.b32.xlu1 %v382_v8, %s1039_s17 }
 0x2b6   : > { %v465_v35 = vpop.xlane.xlu0 %464 }
 0x2b7   : > { %v468_v36 = vsub.f32 %v455_v26, %v465_v35 }
 0x2b8   : > { %v459_v37 = vpop.xlane.xlu1 %458 }
 0x2b9   : > { %v473_v38 = vmul.f32 1.442695, %v468_v36  ;;  %v466_v39 = vsub.f32 %v453_v29, %v459_v37 }
 0x2bb   : > { %932 = vpow2.f32 %v473_v38  ;;  %v469_v40 = vmul.f32 1.442695, %v466_v39 }
 0x2bc   : > { %v462_v41 = vpop.xlane.xlu1 %461 }
 0x2bd   : > { %934 = vpow2.f32 %v469_v40  ;;  %v467_v42 = vsub.f32 %v454_v33, %v462_v41 }
 0x2bf   : > { %v471_v43 = vmul.f32 1.442695, %v467_v42 }
 0x2c0   : > { %v495_v44 = vpop.permute.xlu1 %494 }
 0x2c1   : > { %936 = vpow2.f32 %v471_v43  ;;  %v505_v45 = vsel %vm503_vm4, %v495_v44, 0  ;;  %847 = vmatprep.subr.msk.bf16.mxu0 %vm503_vm4, %v495_v44 }
 0x2c2   : > { %832 = vmatpush3.bf16.msra.mxu0 %v505_v45 }
 0x2c8   : > { %v933_v46 = vpop.eup %932 }
 0x2c9   : > { %v481_v47 = vsel %vm456_vm3, %v933_v46, 0.0 }
 0x2ca   : > { %v935_v48 = vpop.eup %934  ;;  %482 = vadd.xlane.f32.xlu1 %v481_v47 }
 0x2cb   : > { %v475_v49 = vsel %vm456_vm3, %v935_v48, 0.0 }
 0x2ce   : > { %v937_v50 = vpop.eup %936  ;;  %476 = vadd.xlane.f32.xlu1 %v475_v49 }
 0x2cf   : > { %v478_v51 = vsel %vm456_vm3, %v937_v50, 0.0 }
 0x2d2   : > { %479 = vadd.xlane.f32.xlu1 %v478_v51 }
 0x2e3   : > { %492 = vrot.lane.b32.xlu1 %v381_v15, %s1039_s17 }
 0x353   : > { %v483_v52 = vpop.xlane.xlu1 %482 }
 0x354   : > { %938 = vrcp.f32 %v483_v52 }
 0x357   : > { %v477_v53 = vpop.xlane.xlu1 %476 }
 0x358   : > { %940 = vrcp.f32 %v477_v53 }
 0x35b   : > { %v480_v54 = vpop.xlane.xlu1 %479 }
 0x35c   : > { %942 = vrcp.f32 %v480_v54 }
 0x35f   : > { %v493_v55 = vpop.permute.xlu1 %492 }
 0x360   : > { %833 = vmatprep.subr.bf16.mxu0 %v493_v55 }
 0x361   : > { %834 = vmatpush3.bf16.msra.mxu0 %v493_v55  ;;  %v939_v56 = vpop.eup %938 }
 0x362   : > { %v489_v59 = vmul.f32 %v939_v56, %v933_v46  ;;  %848 = vmatprep.subr.msk.bf16.mxu0 %vm503_vm4, %v557_v0 }
 0x364   : > { %v491_v63 = vpack.c.bf16 %v489_v59, %v489_v59 }
 0x365   : > { %v941_v57 = vpop.eup %940 }
 0x366   : > { %v487_v60 = vmul.f32 %v941_v57, %v935_v48 }
 0x369   : > { %v943_v58 = vpop.eup %942 }
 0x36a   : > { %v488_v61 = vmul.f32 %v943_v58, %v937_v50 }
 0x36c   : > { %v490_v62 = vpack.c.bf16 %v488_v61, %v487_v60 }
 0x36e   : > { %835 = vmatprep.mubr.msk.bf16.mxu0 %vm456_vm3, %v490_v62 }
 0x36f   : > { %836 = vmatmul.mubr.msk.bf16.vlgmr.msra.gmra.mxu0 %vm456_vm3, %v491_v63 }
 0x370   : > { %840 = vmatpush3.bf16.msra.mxu0 %v565_v1 }
 0x42f   : > { %v837_v2 = vpop.f32.mrf.mxu0 }
 0x430   : > { %v556_v7 = vpack.c.bf16 %v837_v2, %v837_v2 }
 0x431   : > { %v541_v3 = vpop.f32.mrf.mxu0 }
 0x433   : > { %v838_v4 = vpop.f32.mrf.mxu0 }
 0x435   : > { %v544_v5 = vpop.f32.mrf.mxu0 }
 0x436   : > { %v555_v6 = vpack.c.bf16 %v544_v5, %v541_v3 }
 0x438   : > { %841 = vmatprep.mubr.msk.bf16.mxu0 %vm389_vm1, %v555_v6 }
 0x439   : > { %842 = vmatmul.mubr.msk.bf16.vlgmr.msra.gmra.mxu0 %vm389_vm1, %v556_v7 }
 0x4f9   : > { %v843_v8 = vpop.f32.mrf.mxu0 }
 0x4fb   : > { %v601_v9 = vpop.f32.mrf.mxu0  ;;  %618 = sbr.rel (%p793_p0) target bundleno = 1283 (0x503), region = 44 }
 0x4fd   : > { %v844_v10 = vpop.f32.mrf.mxu0 }
 0x4ff   : > { %v604_v11 = vpop.f32.mrf.mxu0 }
 0x500   : > { %v1040_v12 = vmov 0.0  }
 0x501   : > { %619 = vst.msk [vmem:[#allocation2] sm:$0xff] %vm321_vm0, %v1040_v12  ;;  %620 = vst.msk [vmem:[#allocation2 + $0x8] sm:$0xff] %vm321_vm0, %v1040_v12 }
 0x502   : > { %621 = vst.msk [vmem:[#allocation2 + $0x10] sm:$0xff] %vm321_vm0, %v1040_v12 }
 0x503 PF: > { %p794_p1 = scmp.ne.s32.totalorder %s1020_s21, 3 }
 0x508   : > { %v622_v13 = vld [vmem:[#allocation2] sm:$0xff]  ;;  %v623_v14 = vld [vmem:[#allocation2 + $0x8] sm:$0xff]  ;;  %634 = sbr.rel (%p794_p1) target bundleno = 1303 (0x517), region = 48 }
 0x509   : > { %v624_v15 = vld [vmem:[#allocation2 + $0x10] sm:$0xff]  ;;  %v625_v16 = vadd.f32 %v622_v13, %v601_v9  ;;  %v626_v17 = vadd.f32 %v623_v14, %v604_v11 }
 0x50a   : > { %v627_v18 = vadd.f32 %v843_v8, %v624_v15 }
 0x50b   : > { %628 = vst.msk [vmem:[#allocation2] sm:$0xff] %vm321_vm0, %v625_v16  ;;  %629 = vst.msk [vmem:[#allocation2 + $0x8] sm:$0xff] %vm321_vm0, %v626_v17 }
 0x50c   : > { %630 = vst.msk [vmem:[#allocation2 + $0x10] sm:$0xff] %vm321_vm0, %v627_v18 }
 0x50d   : > { %v795_v20 = vld [vmem:[%s1277_s4] ss:$0 sm:$0xff] }
 0x512   : > { %v635_v19 = vld [vmem:[#allocation2] sm:$0xff]  ;;  %v636_v21 = vld [vmem:[#allocation2 + $0x8] sm:$0xff] }
 0x513   : > { %v645_v22 = vadd.f32 %v795_v20, %v635_v19  ;;  %v646_v23 = vadd.f32 %v795_v20, %v636_v21  ;;  %v637_v24 = vld [vmem:[#allocation2 + $0x10] sm:$0xff] }
 0x514   : > { %v647_v25 = vadd.f32 %v795_v20, %v637_v24 }
 0x515   : > { %648 = vst.msk [vmem:[%s1192_s12] sm:$0xff] %vm321_vm0, %v645_v22  ;;  %649 = vst.msk [vmem:[%s1192_s12 + $0x8] sm:$0xff] %vm321_vm0, %v646_v23 }
 0x516   : > { %650 = vst.msk [vmem:[%s1192_s12 + $0x10] sm:$0xff] %vm321_vm0, %v647_v25 }
 0x517 PF: > { %s851_s21 = smul.u32 384, %s1024_s22  ;;  %s665_s14 = sshll.u32 %s1192_s12, 4  ;;  %s1218_s14 = int_to_ptr.vmem [resolvable:$true] %s665_s14 }
 0x518   : > { %s1222_s26 = scalar_lea.sflag [#allocation4], %s266_s10  ;;  %s944_s27 = scalar_lea.vmem %s1218_s14, 384 }
 0x519   : > { %s1216_s17 = scalar_lea.hbm %s1278_s5, %s851_s21  ;;  %p945_p2 = scmp.ne.s32.totalorder %s1218_s14, %s944_s27 }
 0x51a   : > { %s1041_s22 = smov [#allocation3]  }
 0x51b   : > { %p946_p4 = pnand %p945_p2, %p1123_p3  ;;  %s948_s7 = sshll.u32 %s1041_s22, 4  ;;  %s949_s7 = int_to_ptr.vmem [resolvable:$false] %s948_s7 }
 0x51c   : > { %s950_s8 = scalar_lea.vmem %s949_s7, 768  ;;  %p951_p6 = scmp.lt.s32.totalorder %s1218_s14, %s949_s7 }
 0x51d   : > { %p947_p5 = pneg %p946_p4  ;;  %p952_p7 = scmp.lt.s32.totalorder %s950_s8, %s944_s27 }
 0x51f   : > { %p953_p8 = por %p952_p7, %p951_p6 }
 0x521   : > { %p954_p10 = pnand %p953_p8, %p947_p5 }
 0x523   : > { %957 = shalt.err (!%p954_p10)
}
 0x524   : > { %s958_s10 = scalar_lea.hbm %s1216_s17, 384  ;;  %s962_s13 = scalar_lea.hbm %s1278_s5, 768 }
 0x525   : > { %p959_p11 = scmp.ne.s32.totalorder %s1216_s17, %s958_s10  ;;  %p963_p0 = scmp.lt.s32.totalorder %s1216_s17, %s1278_s5 }
 0x526   : > { %p964_p1 = scmp.lt.s32.totalorder %s962_s13, %s958_s10 }
 0x527   : > { %p960_p12 = pnand %p959_p11, %p1123_p3 }
 0x528   : > { %p965_p2 = por %p964_p1, %p963_p0 }
 0x529   : > { %p961_p13 = pneg %p960_p12 }
 0x52b   : > { %p966_p4 = pnand %p965_p2, %p961_p13 }
 0x52d   : > { %969 = shalt.err (!%p966_p4)
}
 0x52e   : > { %s1042_s16 = smov 128   ;;  %s1043_s27 = smov 8  }
 0x52f   : > { %852 = dma.vmem_to_hbm [thread:$0]  (%p1123_p3), %s1218_s14, 384, %s1216_s17, %s1222_s26, %s1042_s16, %s1042_s16, %s1043_s27  }
 0x530 PF: > { %p858_p5 = scmp.ge.s32.totalorder %s1036_s25, 2  ;;  %s680_s22 = sand.u32 1, %s1008_s18  }
 0x531   : > { %s681_s7 = scalar_lea.sflag [#allocation4], %s680_s22 }
 0x532   : > { %p855_p6 = pnand %p858_p5, %p1133_p9 }
 0x534   : > { %p856_p7 = pneg %p855_p6 }
 0x536   : > { %1003 = dma.done.wait (%p856_p7), %s681_s7, 384  }
 0x537   : > { %1005 = vsyncadd (%p856_p7), %s681_s7, 4294966912  ;;  %s18_s25 = sadd.s32 1, %s1036_s25   ;;  %s1281_s18 = smov %s1012_s19 }
 0x538   : > { %p15_p8 = scmp.ge.s32.totalorder %s18_s25, 10   ;;  %s1282_s19 = smov %s1016_s20 }
 0x539   : > { %s1283_s20 = smov %s1141_s9  ;;  %s1284_s21 = smov %s1028_s23 }
 0x53a   : > { %s1285_s22 = smov %s1032_s24  ;;  %s1286_s23 = smov %s1289_s28 }
 0x53b   : > { %s1287_s24 = smov %s1293_s29  ;;  %17 = sbr.rel (!%p15_p8) target bundleno = 5 (0x5), region = 92 }
 0x540   :  { %686 = vsyncpa [#allocation4], 1 }
 0x541   :  { %688 = vsyncpa [#allocation4 + $0x1], 1 }

</bundles_post_ra>
